<compile_context>
chip_gen: v7x
topology: tpu7x:2x2x1
jax: 0.10.0
libtpu: 0.0.40
codegen_flags: <defaults>
</compile_context>

<pallas_src>
import functools

import numpy as np
import jax
import jax.numpy as jnp
from jax import lax
from jax.experimental import pallas as pl
from jax.experimental.pallas import tpu as pltpu


def _round_up(n, m):
    return ((n + m - 1) // m) * m


def _mhga_kernel(x_ref, w_ref, out_ref, *, batch_block, tokens, tokens_padded,
                 embed_dim, num_heads, value_dim, approx_recip):
    Bb, T, Tp = batch_block, tokens, tokens_padded
    E, H, V = embed_dim, num_heads, value_dim
    md = w_ref.dtype                                    # MXU operand dtype (bf16 or f32)

    # One fused MXU pass: [k | v | s_num] = x @ [Wk^T | Wv^T | Wk^T (q/||q||)^T].
    x = x_ref[0].astype(md)                                            # (Bb*Tp, E)
    f = jnp.dot(x, w_ref[...], preferred_element_type=jnp.float32)     # (Bb*Tp, E+V+H)

    k = f[:, :E]                                                       # (Bb*Tp, E)
    v = f[:, E:E + V]                                                  # (Bb*Tp, V)
    sn = f[:, E + V:]                                                  # (Bb*Tp, H)

    # s = (k @ (q/||q||)^T) / ||k||, then ReLU.  No epsilon on ||k|| (matches
    # torch; an all-zero token row yields NaN exactly like the reference, and
    # zero-padded batches produce NaN rows that the wrapper slices off).
    inv_k = lax.rsqrt(jnp.sum(k * k, axis=-1, keepdims=True))          # (Bb*Tp, 1)
    s = jnp.maximum(sn * inv_k, 0.0)                                   # (Bb*Tp, H)

    # Per-batch softmax over tokens.  Tp % 8 == 0, so these reshapes are
    # sublane-aligned leading-dim splits (no relayout copies).
    s3 = s.reshape(Bb, Tp, H)
    v3 = v.reshape(Bb, Tp, V)
    if Tp != T:
        # Mask padded token rows (also squashes their 0*inf NaNs) so they get
        # zero attention weight.
        tok = lax.broadcasted_iota(jnp.int32, (Bb, Tp, H), 1)
        s3 = jnp.where(tok < T, s3, -1e30)
    m = jnp.max(s3, axis=1, keepdims=True)                             # (Bb, 1, H)
    e = jnp.exp(s3 - m)
    denom = jnp.sum(e, axis=1, keepdims=True)                          # (Bb, 1, H)
    a = e * pl.reciprocal(denom, approx=approx_recip)                  # (Bb, Tp, H)

    # Final contraction h[b,h,:] = sum_t a[b,t,h] * v[b,t,:] on the VPU (an
    # (H,V) MXU tile would be <1% utilized), kept in f32, assembled directly
    # into the lane-dense (Bb, H*V) output slab and stored in one shot.
    cols = [jnp.sum(a[:, :, hd:hd + 1] * v3, axis=1) for hd in range(H)]   # each (Bb, V)
    out_ref[0] = jnp.concatenate(cols, axis=-1).astype(out_ref.dtype)      # (Bb, H*V)


def multihead_global_attention(x, q, w_key, w_value, *, matmul_dtype=jnp.bfloat16):
    """x: (B, T, E); q: (H, E); w_key: (E, E) and w_value: (V, E) in torch
    (out, in) layout.  Returns h: (B, H, V) in float32."""
    B, T, E = x.shape
    H = q.shape[0]
    V = w_value.shape[0]
    matmul_dtype = np.dtype(matmul_dtype)

    # ---- batch-invariant weight prep (XLA glue, f32) -------------------------
    wkT = w_key.T.astype(jnp.float32)                                   # (E, E)
    wvT = w_value.T.astype(jnp.float32)                                 # (E, V)
    q32 = q.astype(jnp.float32)
    qTn = (q32 / jnp.linalg.norm(q32, axis=-1, keepdims=True)).T        # (E, H)
    wq = jnp.dot(wkT, qTn, precision=lax.Precision.HIGHEST)             # (E, H): score-numerator weights
    w_fused = jnp.concatenate([wkT, wvT, wq], axis=-1).astype(matmul_dtype)   # (E, E+V+H)

    # ---- generation-aware sizing ---------------------------------------------
    vmem_phys = 64 * 1024 * 1024          # conservative fallback (v7x per-TC VMEM)
    try:
        vmem_phys = int(pltpu.get_tpu_info().vmem_capacity_bytes)
    except Exception:
        pass
    kind = ""
    try:
        kind = jax.devices()[0].device_kind.lower()
    except Exception:
        pass
    two_tc = ("v7" in kind) or ("7x" in kind) or (
        vmem_phys <= 80 * 1024 * 1024 and "v5" not in kind and "v6" not in kind)
    n_tc = 2 if two_tc else 1
    if two_tc:                       # v7x: 64 MiB / TC, 2 TensorCores
        block_budget = 16 * 1024 * 1024
        vmem_limit = 48 * 1024 * 1024
    else:                            # v5e / v6e: single TC, 128 MiB VMEM
        block_budget = 28 * 1024 * 1024
        vmem_limit = 96 * 1024 * 1024
    vmem_limit = min(vmem_limit, max(32 * 1024 * 1024, (vmem_phys * 3) // 4))

    # ---- padded shapes + real (8,128)-tile-padded VMEM footprint -------------
    Tp = _round_up(T, 8)
    lp = lambda n: _round_up(max(n, 1), 128)
    xb = np.dtype(x.dtype).itemsize
    mb = matmul_dtype.itemsize
    per_batch = Tp * (lp(E) * (2 * xb + mb + 4)        # x block (double-buffered) + in-kernel cast + k*k temp
                      + lp(E + V + H) * 4              # fused projection result (f32)
                      + 3 * lp(H) * 4                  # s / exp / a (f32)
                      + 2 * lp(V) * 4)                 # v view + per-head mul temp (f32)
    per_batch += 2 * lp(H * V) * 4                     # output slab (double-buffered)
    per_batch = int(per_batch * 1.25)                  # scheduler / relayout slack

    max_bb = max(1, block_budget // per_batch)
    if n_tc >= 2 and B >= 2:
        nb = max(n_tc, pl.cdiv(B, max_bb))
        nb = _round_up(nb, n_tc)                       # keep both TensorCores busy
    else:
        nb = max(1, pl.cdiv(B, max_bb))                # 1-TC: biggest possible block
    Bb = pl.cdiv(B, nb)
    nb = pl.cdiv(B, Bb)
    if n_tc >= 2 and B >= 2:
        nb = _round_up(nb, n_tc)
    Bp = nb * Bb

    # ---- pad + fold batches into MXU rows (keep caller dtype; cast in-kernel) -
    xp = x
    if Tp != T:
        xp = jnp.pad(xp, ((0, 0), (0, Tp - T), (0, 0)))
    if Bp != B:
        # Padded batches produce NaN rows (zero-norm keys); sliced off below.
        xp = jnp.pad(xp, ((0, Bp - B), (0, 0), (0, 0)))
    x3 = xp.reshape(nb, Bb * Tp, E)

    kernel = functools.partial(
        _mhga_kernel, batch_block=Bb, tokens=T, tokens_padded=Tp,
        embed_dim=E, num_heads=H, value_dim=V,
        approx_recip=(matmul_dtype != np.dtype(np.float32)))

    out = pl.pallas_call(
        kernel,
        out_shape=jax.ShapeDtypeStruct((nb, Bb, H * V), jnp.float32),
        grid_spec=pltpu.PrefetchScalarGridSpec(
            num_scalar_prefetch=0,
            grid=(nb,),
            in_specs=[
                pl.BlockSpec((1, Bb * Tp, E), lambda i: (i, 0, 0)),
                pl.BlockSpec((E, E + V + H), lambda i: (0, 0)),
            ],
            out_specs=pl.BlockSpec((1, Bb, H * V), lambda i: (i, 0, 0)),
        ),
        compiler_params=pltpu.CompilerParams(
            dimension_semantics=("parallel",),
            vmem_limit_bytes=int(vmem_limit),
        ),
    )(x3, w_fused)

    return out.reshape(Bp, H, V)[:B]


def _reference(x, q, w_key, w_value):
    # Pure-JAX reference mirroring the PyTorch forward (true f32 matmuls).
    hp = lax.Precision.HIGHEST
    k = jnp.einsum("bte,oe->bto", x, w_key, precision=hp)        # (B, T, E)
    v = jnp.einsum("bte,oe->bto", x, w_value, precision=hp)      # (B, T, V)
    q_norm = jnp.linalg.norm(q, axis=-1)                         # (H,)
    k_norm = jnp.linalg.norm(k, axis=-1)                         # (B, T)
    s = jnp.einsum("bte,he->bth", k, q, precision=hp) / q_norm / k_norm[..., None]
    s = jnp.maximum(s, 0.0)
    a = jax.nn.softmax(s, axis=1)
    h = jnp.einsum("btn,bte->bne", a, v, precision=hp)
    return h


if __name__ == "__main__":
    # Small shapes consistent with the module: B=2, T=8, E=32, H=4, V=16
    B, T, E, H, V = 2, 8, 32, 4, 16
    key = jax.random.PRNGKey(0)
    kx, kq, kk, kv = jax.random.split(key, 4)

    x = jax.random.normal(kx, (B, T, E), dtype=jnp.float32)
    q = jax.random.normal(kq, (H, E), dtype=jnp.float32)
    w_key = jax.random.normal(kk, (E, E), dtype=jnp.float32) * (1.0 / jnp.sqrt(E))
    w_value = jax.random.normal(kv, (V, E), dtype=jnp.float32) * (1.0 / jnp.sqrt(E))

    ref = _reference(x, q, w_key, w_value)

    # f32 MXU path: tight semantic check.
    out_f32 = jax.block_until_ready(
        multihead_global_attention(x, q, w_key, w_value, matmul_dtype=jnp.float32))
    assert out_f32.shape == (B, H, V)
    assert jnp.allclose(out_f32, ref, atol=2e-3, rtol=2e-3), "f32 path mismatch vs reference"

    # bf16 MXU fast path (default): looser tolerance for bf16 operand rounding.
    out_bf16 = jax.block_until_ready(
        multihead_global_attention(x, q, w_key, w_value))
    assert out_bf16.shape == (B, H, V)
    assert jnp.allclose(out_bf16, ref, atol=5e-2, rtol=5e-2), "bf16 path mismatch vs reference"

    # Ragged shapes: exercises token padding/masking (T=12 -> Tp=16) and,
    # on 2-TC parts, batch padding (B=3 -> Bp=4).
    B2, T2 = 3, 12
    kx2 = jax.random.split(key, 5)[4]
    x2 = jax.random.normal(kx2, (B2, T2, E), dtype=jnp.float32)
    ref2 = _reference(x2, q, w_key, w_value)
    out2 = jax.block_until_ready(
        multihead_global_attention(x2, q, w_key, w_value, matmul_dtype=jnp.float32))
    assert out2.shape == (B2, H, V)
    assert jnp.allclose(out2, ref2, atol=2e-3, rtol=2e-3), "padded/masked path mismatch vs reference"

    print("KERNEL_OK")
</pallas_src>

<mosaic_0001>
module attributes {stable_mosaic.version = 11 : i64} {
  func.func @_mhga_kernel(%arg0: i32, %arg1: memref<1x8x32xf32, #tpu.memory_space<vmem>>, %arg2: memref<32x52xf32, #tpu.memory_space<vmem>>, %arg3: memref<1x1x64xf32, #tpu.memory_space<vmem>>) attributes {dimension_semantics = [#tpu.dimension_semantics<parallel>], iteration_bounds = array<i64: 2>, scalar_prefetch = 0 : i64, scratch_operands = 0 : i64, tpu.core_type = #tpu.core_type<tc>, window_params = [{transform_indices = @transform_0, window_bounds = array<i64: 1, 8, 32>}, {pipeline_mode = #tpu.pipeline_mode<synchronous>, transform_indices = @transform_1, window_bounds = array<i64: 32, 52>}, {transform_indices = @transform_2, window_bounds = array<i64: 1, 1, 64>}]} {
    %c0 = arith.constant 0 : index
    %c0_0 = arith.constant 0 : index
    %c0_1 = arith.constant 0 : index
    %0 = vector.load %arg1[%c0, %c0_0, %c0_1] : memref<1x8x32xf32, #tpu.memory_space<vmem>>, vector<1x8x32xf32>
    %1 = vector.shape_cast %0 : vector<1x8x32xf32> to vector<8x32xf32>
    %c0_2 = arith.constant 0 : index
    %c0_3 = arith.constant 0 : index
    %2 = vector.load %arg2[%c0_2, %c0_3] : memref<32x52xf32, #tpu.memory_space<vmem>>, vector<32x52xf32>
    %cst = arith.constant dense<0.000000e+00> : vector<8x52xf32>
    %3 = tpu.matmul %1, %2, %cst {dimension_numbers = #tpu.dot_dimension_numbers<[1], [0], [0], [1], [0, 0, 1, 1], [], []>} : vector<8x32xf32>, vector<32x52xf32>, vector<8x52xf32> -> vector<8x52xf32>
    %4 = vector.extract_strided_slice %3 {offsets = [0, 0], sizes = [8, 32], strides = [1, 1]} : vector<8x52xf32> to vector<8x32xf32>
    %5 = vector.extract_strided_slice %3 {offsets = [0, 32], sizes = [8, 16], strides = [1, 1]} : vector<8x52xf32> to vector<8x16xf32>
    %6 = vector.extract_strided_slice %3 {offsets = [0, 48], sizes = [8, 4], strides = [1, 1]} : vector<8x52xf32> to vector<8x4xf32>
    %7 = arith.mulf %4, %4 : vector<8x32xf32>
    %cst_4 = arith.constant dense<0.000000e+00> : vector<8xf32>
    %8 = vector.multi_reduction <add>, %7, %cst_4 [1] : vector<8x32xf32> to vector<8xf32>
    %9 = vector.shape_cast %8 : vector<8xf32> to vector<8x1xf32>
    %10 = math.rsqrt %9 : vector<8x1xf32>
    %11 = vector.broadcast %10 : vector<8x1xf32> to vector<8x4xf32>
    %12 = arith.mulf %6, %11 : vector<8x4xf32>
    %cst_5 = arith.constant 0.000000e+00 : f32
    %13 = vector.broadcast %cst_5 : f32 to vector<8x4xf32>
    %14 = arith.maximumf %12, %13 : vector<8x4xf32>
    %15 = vector.shape_cast %14 : vector<8x4xf32> to vector<1x8x4xf32>
    %16 = vector.shape_cast %5 : vector<8x16xf32> to vector<1x8x16xf32>
    %cst_6 = arith.constant dense<0xFF800000> : vector<1x4xf32>
    %17 = vector.multi_reduction <maximumf>, %15, %cst_6 [1] : vector<1x8x4xf32> to vector<1x4xf32>
    %18 = vector.shape_cast %17 : vector<1x4xf32> to vector<1x1x4xf32>
    %19 = vector.broadcast %18 : vector<1x1x4xf32> to vector<1x8x4xf32>
    %20 = arith.subf %15, %19 : vector<1x8x4xf32>
    %21 = math.exp %20 : vector<1x8x4xf32>
    %cst_7 = arith.constant dense<0.000000e+00> : vector<1x4xf32>
    %22 = vector.multi_reduction <add>, %21, %cst_7 [1] : vector<1x8x4xf32> to vector<1x4xf32>
    %23 = vector.shape_cast %22 : vector<1x4xf32> to vector<1x1x4xf32>
    %24 = tpu.reciprocal %23 : vector<1x1x4xf32> -> vector<1x1x4xf32>
    %25 = vector.broadcast %24 : vector<1x1x4xf32> to vector<1x8x4xf32>
    %26 = arith.mulf %21, %25 : vector<1x8x4xf32>
    %27 = vector.extract_strided_slice %26 {offsets = [0, 0, 0], sizes = [1, 8, 1], strides = [1, 1, 1]} : vector<1x8x4xf32> to vector<1x8x1xf32>
    %28 = vector.broadcast %27 : vector<1x8x1xf32> to vector<1x8x16xf32>
    %29 = arith.mulf %28, %16 : vector<1x8x16xf32>
    %cst_8 = arith.constant dense<0.000000e+00> : vector<1x16xf32>
    %30 = vector.multi_reduction <add>, %29, %cst_8 [1] : vector<1x8x16xf32> to vector<1x16xf32>
    %31 = vector.extract_strided_slice %26 {offsets = [0, 0, 1], sizes = [1, 8, 1], strides = [1, 1, 1]} : vector<1x8x4xf32> to vector<1x8x1xf32>
    %32 = vector.broadcast %31 : vector<1x8x1xf32> to vector<1x8x16xf32>
    %33 = arith.mulf %32, %16 : vector<1x8x16xf32>
    %cst_9 = arith.constant dense<0.000000e+00> : vector<1x16xf32>
    %34 = vector.multi_reduction <add>, %33, %cst_9 [1] : vector<1x8x16xf32> to vector<1x16xf32>
    %35 = vector.extract_strided_slice %26 {offsets = [0, 0, 2], sizes = [1, 8, 1], strides = [1, 1, 1]} : vector<1x8x4xf32> to vector<1x8x1xf32>
    %36 = vector.broadcast %35 : vector<1x8x1xf32> to vector<1x8x16xf32>
    %37 = arith.mulf %36, %16 : vector<1x8x16xf32>
    %cst_10 = arith.constant dense<0.000000e+00> : vector<1x16xf32>
    %38 = vector.multi_reduction <add>, %37, %cst_10 [1] : vector<1x8x16xf32> to vector<1x16xf32>
    %39 = vector.extract_strided_slice %26 {offsets = [0, 0, 3], sizes = [1, 8, 1], strides = [1, 1, 1]} : vector<1x8x4xf32> to vector<1x8x1xf32>
    %40 = vector.broadcast %39 : vector<1x8x1xf32> to vector<1x8x16xf32>
    %41 = arith.mulf %40, %16 : vector<1x8x16xf32>
    %cst_11 = arith.constant dense<0.000000e+00> : vector<1x16xf32>
    %42 = vector.multi_reduction <add>, %41, %cst_11 [1] : vector<1x8x16xf32> to vector<1x16xf32>
    %43 = tpu.concatenate %30, %34, %38, %42 in 1 : vector<1x16xf32>, vector<1x16xf32>, vector<1x16xf32>, vector<1x16xf32> -> vector<1x64xf32>
    %c0_12 = arith.constant 0 : index
    %c0_13 = arith.constant 0 : index
    %c0_14 = arith.constant 0 : index
    %44 = vector.load %arg3[%c0_12, %c0_13, %c0_14] : memref<1x1x64xf32, #tpu.memory_space<vmem>>, vector<1x1x64xf32>
    %45 = vector.shape_cast %44 : vector<1x1x64xf32> to vector<1x64xf32>
    %46 = vector.shape_cast %43 : vector<1x64xf32> to vector<1x1x64xf32>
    tpu.vector_store %arg3[%c0_12, %c0_13, %c0_14], %46 {strides = array<i32>} : memref<1x1x64xf32, #tpu.memory_space<vmem>>, vector<1x1x64xf32>,
    return
  }
  func.func @transform_0(%arg0: i32) -> (i32, i32, i32) {
    %c0_i32 = arith.constant 0 : i32
    %c0_i32_0 = arith.constant 0 : i32
    %c0_i32_1 = arith.constant 0 : i32
    return %arg0, %c0_i32, %c0_i32_0 : i32, i32, i32
  }
  func.func @transform_1(%arg0: i32) -> (i32, i32) {
    %c0_i32 = arith.constant 0 : i32
    %c0_i32_0 = arith.constant 0 : i32
    %c0_i32_1 = arith.constant 0 : i32
    return %c0_i32, %c0_i32_0 : i32, i32
  }
  func.func @transform_2(%arg0: i32) -> (i32, i32, i32) {
    %c0_i32 = arith.constant 0 : i32
    %c0_i32_0 = arith.constant 0 : i32
    %c0_i32_1 = arith.constant 0 : i32
    return %arg0, %c0_i32, %c0_i32_0 : i32, i32, i32
  }
}

</mosaic_0001>

<bundles_post_ra>
// kernel: tpu_custom_call.1
= control target key start
LH: loop header
LB: loop body
LE: loop exit
PB: predicated region body
PF: predicated region fallthrough
CT: control target
= control target key end

     0   :  { %7 = vsyncpa [#allocation3], 0  ;;  %s925_s0 = inlined_call_operand.hbm [shape: f32[2,8,32], index: 0, kind: input, shape index: {}]   ;;  %s926_s1 = inlined_call_operand.hbm [shape: f32[32,52], index: 1, kind: input, shape index: {}]   ;;  %s927_s2 = inlined_call_operand.hbm [shape: f32[2,1,64], index: 2, kind: output, shape index: {}]  }
   0x1   :  { %9 = vsyncpa [#allocation3 + $0x1], 0 }
   0x2   :  { %10 = vsyncpa [#allocation6], 0 }
   0x3   :  { %11 = vsyncpa [#allocation4], 0 }
   0x4   :  { %13 = vsyncpa [#allocation4 + $0x1], 0  ;;  %s712_s9 = smov 0   ;;  %s714_s10 = smov 0  }
   0x5   :  { %s716_s11 = smov 0   ;;  %s718_s12 = smov 0  }
   0x6 LB: > { %s733_s13 = sadd.s32 4294967295, %s680_s12   ;;  %s437_s14 = sadd.s32 4294967294, %s680_s12   ;;  %s680_s12 = sphi %s718_s12, %s947_s12   ;;  %s676_s11 = sphi %s716_s11, %s946_s11   ;;  %s672_s10 = sphi %s714_s10, %s945_s10   ;;  %s668_s9 = sphi %s712_s9, %s944_s9  }
   0x7   : > { %p39_p0 = scmp.ne.s32.totalorder %s672_s10, %s668_s9  ;;  %p928_p1 = scmp.eq.s32.totalorder %s733_s13, 0 }
   0x8   : > { %p90_p3 = scmp.eq.s32.totalorder %s437_s14, 1  ;;  %p438_p5 = scmp.ge.s32.totalorder %s680_s12, 1 }
   0x9   : > { %p742_p4 = por %p928_p1, %p39_p0  ;;  %p97_p7 = scmp.lt.s32.totalorder %s680_s12, 3 }
   0xa   : > { %p747_p6 = por %p90_p3, %p39_p0  ;;  %s682_s18 = smov [#allocation5]  }
   0xb   : > { %s931_s15 = scalar_select %p742_p4, 1, 0 }
   0xc   : > { %s932_s16 = scalar_select %p747_p6, 1, 0 }
   0xd   : > { %p752_p8 = pnand %p438_p5, %p97_p7  ;;  %s109_s19 = sshll.u32 %s682_s18, 4  ;;  %s756_s19 = int_to_ptr.vmem [resolvable:$true] %s109_s19 }
   0xe   : > { %s768_s21 = sadd.s32 1, %s680_s12   ;;  %s26_s22 = sadd.s32 1, %s676_s11 }
   0xf   : > { %s933_s17 = scalar_select %p752_p8, 1, 0 }
  0x10   : > { %p480_p9 = pneg %p752_p8  ;;  %s23_s23 = ssub.s32 %s680_s12, %s768_s21 }
  0x11   : > { %s552_s26 = scalar_lea.hbm %s926_s1, 512 }
  0x12   : > { %p763_p11 = pnand %p480_p9, %p928_p1  ;;  %p553_p12 = scmp.ne.s32.totalorder %s926_s1, %s552_s26 }
  0x13   : > { %p559_p5 = scmp.lt.u32.totalorder %s552_s26, %s926_s1 }
  0x14   : > { %p554_p13 = pneg %p763_p11 }
  0x16   : > { %p555_p0 = pnand %p554_p13, %p553_p12 }
  0x18   : > { %p556_p3 = pneg %p555_p0 }
  0x1a   : > { %p561_p7 = pnand %p559_p5, %p556_p3 }
  0x1c   : > { %564 = shalt.err (!%p561_p7)
}
  0x1d   : > { %s565_s3 = scalar_lea.vmem %s756_s19, 512  ;;  %p573_p2 = scmp.lt.s32.totalorder %s756_s19, %s756_s19 }
  0x1e   : > { %p566_p9 = scmp.ne.s32.totalorder %s756_s19, %s565_s3  ;;  %p574_p6 = scmp.lt.s32.totalorder %s565_s3, %s565_s3 }
  0x20   : > { %p568_p10 = pnand %p566_p9, %p554_p13  ;;  %p575_p4 = por %p574_p6, %p573_p2 }
  0x22   : > { %p569_p1 = pneg %p568_p10 }
  0x24   : > { %p576_p8 = pnand %p575_p4, %p569_p1 }
  0x26   : > { %579 = shalt.err (!%p576_p8)
}
  0x27   : > { %s683_s4 = smov 128   ;;  %s684_s5 = smov 8  }
  0x28   : > { %483 = dma.hbm_to_vmem [thread:$0]  (!%p763_p11), %s926_s1, 512, %s756_s19, [#allocation6], %s683_s4, %s683_s4, %s684_s5  }
  0x29   : > { %p24_p2 = scmp.eq.s32.totalorder %s23_s23, 0  ;;  %p33_p1 = scmp.ne.s32.totalorder %s676_s11, %s672_s10 }
  0x2a   : > { %p34_p4 = scmp.eq.s32.totalorder %s680_s12, 0  ;;  %p493_p6 = scmp.lt.s32.totalorder %s680_s12, 2 }
  0x2b   : > { %s799_s8 = scalar_select %p24_p2, %s676_s11, %s26_s22  }
  0x2c   : > { %p35_p8 = por %p34_p4, %p33_p1  ;;  %p935_p10 = scmp.eq.s32.totalorder %s733_s13, 1 }
  0x2d   : > { %s123_s18 = sand.u32 1, %s676_s11   ;;  %s442_s24 = sshll.u32 %s680_s12, 7 }
  0x2e   : > { %p803_p12 = por %p935_p10, %p33_p1  ;;  %s441_s25 = sshll.u32 %s123_s18, 3 }
  0x2f   : > { %s812_s27 = scalar_lea.hbm %s925_s0, %s442_s24  ;;  %s127_s19 = scalar_lea.vmem [#allocation2], %s441_s25 }
  0x30   : > { %s134_s22 = sshll.u32 %s127_s19, 4  ;;  %p814_p11 = pnand %p493_p6, %p35_p8  ;;  %s818_s22 = int_to_ptr.vmem [resolvable:$true] %s134_s22 }
  0x31   : > { %s124_s28 = scalar_lea.sflag [#allocation3], %s123_s18  ;;  %s580_s29 = scalar_lea.hbm %s812_s27, 128 }
  0x32   : > { %p581_p13 = scmp.ne.s32.totalorder %s812_s27, %s580_s29  ;;  %p582_p0 = pneg %p814_p11 }
  0x33   : > { %s585_s4 = scalar_lea.hbm %s925_s0, 256  ;;  %p586_p7 = scmp.lt.u32.totalorder %s812_s27, %s925_s0 }
  0x34   : > { %p583_p3 = pnand %p582_p0, %p581_p13  ;;  %p587_p9 = scmp.lt.u32.totalorder %s585_s4, %s580_s29 }
  0x35   : > { %p589_p1 = scmp.lt.u32.totalorder %s580_s29, %s812_s27 }
  0x36   : > { %p584_p5 = pneg %p583_p3  ;;  %p588_p2 = por %p587_p9, %p586_p7 }
  0x38   : > { %p590_p4 = por %p589_p1, %p588_p2 }
  0x3a   : > { %p591_p6 = pnand %p590_p4, %p584_p5 }
  0x3c   : > { %594 = shalt.err (!%p591_p6)
}
  0x3d   : > { %s595_s7 = scalar_lea.vmem %s818_s22, 128  ;;  %s685_s18 = smov [#allocation2]  }
  0x3e   : > { %p596_p8 = scmp.ne.s32.totalorder %s818_s22, %s595_s7  ;;  %s600_s24 = sshll.u32 %s685_s18, 4  ;;  %s601_s24 = int_to_ptr.vmem [resolvable:$false] %s600_s24 }
  0x3f   : > { %s602_s25 = scalar_lea.vmem %s601_s24, 256  ;;  %p603_p3 = scmp.lt.s32.totalorder %s818_s22, %s601_s24 }
  0x40   : > { %p598_p10 = pnand %p596_p8, %p582_p0  ;;  %p604_p7 = scmp.lt.s32.totalorder %s602_s25, %s595_s7 }
  0x42   : > { %p599_p13 = pneg %p598_p10  ;;  %p605_p9 = por %p604_p7, %p603_p3 }
  0x44   : > { %p606_p2 = pnand %p605_p9, %p599_p13 }
  0x46   : > { %609 = shalt.err (!%p606_p2)
}
  0x47   : > { %487 = dma.hbm_to_vmem [thread:$0]  (!%p814_p11), %s812_s27, 128, %s818_s22, %s124_s28  }
  0x48   : > { %p938_p5 = scmp.ne.s32.totalorder %s933_s17, 0 }
  0x49   : > { %s848_s20 = sand.u32 (!%p938_p5), 1, %s672_s10   ;;  %p939_p0 = scmp.ne.s32.totalorder (!%p938_p5), %s931_s15, 0 }
  0x4a   : > { %143 = sbr.rel (%p938_p5) target bundleno = 802 (0x322), region = 28  ;;  %s444_s26 = sshll.u32 (!%p938_p5), %s848_s20, 3 }
  0x4b   : > { %s146_s19 = scalar_lea.sflag (!%p938_p5), [#allocation3], %s848_s20  ;;  %s149_s29 = scalar_lea.vmem (!%p938_p5), [#allocation2], %s444_s26 }
  0x51   : > { %655 = dma.done.wait (%p939_p0), %s146_s19, 128  }
  0x52   : > { %657 = vsyncadd (%p939_p0), %s146_s19, 4294967168  ;;  %p940_p1 = scmp.eq.s32.totalorder %s733_s13, 0 }
  0x54   : > { %659 = dma.done.wait (%p940_p1), [#allocation6], 512   ;;  %p941_p11 = pmov %p940_p1 }
  0x55   : > { %v686_v0 = vmov 0.0|0.0   ;;  %vm687_vm0 = vmmov 0   ;;  %v688_v1 = vmov 0.0   ;;  %v174_v2 = vld [vmem:[#allocation5] sm:$0xff]  ;;  %v175_v3 = vld [vmem:[#allocation5 + $0x8] sm:$0xff]  ;;  %v176_v4 = vld [vmem:[#allocation5 + $0x10] sm:$0xff] }
  0x56   : > { %661 = vsyncadd (%p941_p11), [#allocation6], 4294966784  ;;  %466 = vmatprep.subr.bf16.mxu0 %v686_v0  ;;  %463 = vmatprep.mubr.msk.f32.mxu0 %vm687_vm0, %v688_v1  ;;  %v467_v5 = vpack.c.bf16 %v175_v3, %v174_v2  ;;  %v177_v6 = vld [vmem:[#allocation5 + $0x18] sm:$0xff]  ;;  %vm178_vm1 = vcmask 261120   ;;  %v689_v13 = vmov 49   ;;  %v690_v14 = vmov 48  }
  0x57   : > { %v470_v7 = vpack.c.bf16 %v177_v6, %v176_v4  ;;  %v173_v8 = vld [vmem:[%s149_s29] sm:$0xff]  ;;  %542 = vset.pattern.permute.xlu1 %v689_v13  ;;  %541 = vset.pattern.permute.xlu0 %v690_v14  ;;  %vm259_vm2 = vcmask 425344   ;;  %v691_v38 = vmov 51   ;;  %v692_v39 = vmov 50   ;;  %s693_s15 = smov 96   ;;  %s694_s17 = smov 112  }
  0x58   : > { %468 = vmatpush3.bf16.msra.mxu0 %v467_v5  ;;  %vm285_vm3 = vcmask 392448   ;;  %s695_s27 = smov 16   ;;  %vm341_vm4 = vcmask 130048   ;;  %s447_s22 = sshll.u32 %s733_s13, 4  ;;  %vm344_vm5 = vcmask 392192   ;;  %vm346_vm6 = vcmask 516096  }
  0x59   : > { %469 = vmatprep.subr.bf16.mxu0 %v686_v0  ;;  %s172_s23 = scalar_lea.vmem [#allocation7], %s848_s20  ;;  %s881_s4 = scalar_lea.hbm %s927_s2, %s447_s22 }
  0x5a   : > { %s361_s28 = sshll.u32 %s172_s23, 4  ;;  %s349_s13 = scalar_lea.sflag [#allocation4], %s848_s20  ;;  %s883_s28 = int_to_ptr.vmem [resolvable:$true] %s361_s28 }
  0x5b   : > { %s610_s5 = scalar_lea.vmem %s883_s28, 16  ;;  %s696_s6 = smov [#allocation7]  }
  0x5c   : > { %471 = vmatpush3.bf16.msra.mxu0 %v470_v7  ;;  %p611_p4 = scmp.ne.s32.totalorder %s883_s28, %s610_s5  ;;  %s614_s7 = sshll.u32 %s696_s6, 4  ;;  %s615_s7 = int_to_ptr.vmem [resolvable:$false] %s614_s7 }
  0x5d   : > { %s616_s18 = scalar_lea.vmem %s615_s7, 32  ;;  %p617_p10 = scmp.lt.s32.totalorder %s883_s28, %s615_s7 }
  0x5e   : > { %p612_p6 = pnand %p611_p4, %p803_p12  ;;  %p618_p13 = scmp.lt.s32.totalorder %s616_s18, %s610_s5 }
  0x5f   : > { %464 = vmatmul.mubr.msk.f32.vlgmr.msra.gmra.mrb[0].mxu0 %vm178_vm1, %v173_v8 }
  0x60   : > { %p613_p8 = pneg %p612_p6  ;;  %p619_p3 = por %p618_p13, %p617_p10 }
  0x62   : > { %p620_p7 = pnand %p619_p3, %p613_p8 }
 0x132   : > { %v861_v9 = vpop.f32.mrb[0].mxu0 }
 0x133   : > { %v465_v10 = vpop.f32.mrb[1].mxu0  ;;  %v252_v11 = vmul.f32 %v861_v9, %v861_v9 }
 0x135   : > { %v253_v12 = vsel %vm178_vm1, %v252_v11, 0.0 }
 0x136   : > { %254 = vadd.xlane.f32.xlu0 %v253_v12 }
 0x1c3   : > { %v255_v15 = vpop.xlane.xlu0 %254 }
 0x1c4   : > { %546 = vrsqrt.f32 %v255_v15 }
 0x1ce   : > { %v547_v16 = vpop.eup %546 }
 0x1cf   : > { %v257_v17 = vmul.f32 %v547_v16, %v861_v9 }
 0x1d1   : > { %v258_v18 = vmax.f32 %v257_v17, 0.0 }
 0x1d3   : > { %v260_v19 = vsel %vm259_vm2, %v258_v18, -inf }
 0x1d4   : > { %v261_v20 = vrot.slane %v260_v19, 4 }
 0x1d6   : > { %v262_v21 = vmax.f32 %v260_v19, %v261_v20 }
 0x1d8   : > { %v263_v22 = vrot.slane %v262_v21, 2 }
 0x1da   : > { %v264_v23 = vmax.f32 %v262_v21, %v263_v22 }
 0x1dc   : > { %v265_v24 = vrot.slane %v264_v23, 1 }
 0x1de   : > { %v266_v25 = vmax.f32 %v264_v23, %v265_v24 }
 0x1e0   : > { %v267_v26 = vsub.f32 %v258_v18, %v266_v25 }
 0x1e2   : > { %v268_v27 = vmul.f32 1.442695, %v267_v26 }
 0x1e4   : > { %548 = vpow2.f32 %v268_v27 }
 0x1ee   : > { %v549_v28 = vpop.eup %548 }
 0x1ef   : > { %v270_v29 = vsel %vm259_vm2, %v549_v28, 0.0 }
 0x1f0   : > { %v271_v30 = vrot.slane %v270_v29, 4 }
 0x1f2   : > { %v272_v31 = vadd.f32 %v271_v30, %v270_v29 }
 0x1f4   : > { %v273_v32 = vrot.slane %v272_v31, 2 }
 0x1f6   : > { %v274_v33 = vadd.f32 %v273_v32, %v272_v31 }
 0x1f8   : > { %v275_v34 = vrot.slane %v274_v33, 1 }
 0x1fa   : > { %v276_v35 = vadd.f32 %v275_v34, %v274_v33 }
 0x1fc   : > { %550 = vrcp.f32 %v276_v35 }
 0x206   : > { %v551_v36 = vpop.eup %550 }
 0x207   : > { %v278_v37 = vmul.f32 %v551_v36, %v549_v28 }
 0x209   : > { %294 = vperm.xlu1 %542, %v278_v37   ;;  %281 = vperm.xlu0 %541, %v278_v37  }
 0x20d   : > { %543 = vset.pattern.permute.xlu1 %v691_v38  ;;  %545 = vset.pattern.permute.xlu0 %v691_v38 }
 0x20e   : > { %318 = vperm.xlu1 %543, %v278_v37  }
 0x212   : > { %544 = vset.pattern.permute.xlu1 %v692_v39 }
 0x213   : > { %306 = vperm.xlu1 %544, %v278_v37  }
 0x288   : > { %v295_v40 = vpop.permute.xlu1 %294  ;;  %v282_v41 = vpop.permute.xlu0 %281 }
 0x289   : > { %v297_v42 = vmul.f32 %v295_v40, %v861_v9  ;;  %v284_v43 = vmul.f32 %v282_v41, %v861_v9 }
 0x28b   : > { %v298_v44 = vsel %vm285_vm3, %v297_v42, 0.0  ;;  %v286_v45 = vsel %vm285_vm3, %v284_v43, 0.0 }
 0x28c   : > { %v299_v46 = vrot.slane %v298_v44, 4  ;;  %v287_v47 = vrot.slane %v286_v45, 4 }
 0x28d   : > { %v319_v48 = vpop.permute.xlu1 %318 }
 0x28e   : > { %v300_v49 = vadd.f32 %v299_v46, %v298_v44  ;;  %v288_v50 = vadd.f32 %v287_v47, %v286_v45  ;;  %v321_v51 = vmul.f32 %v319_v48, %v861_v9 }
 0x290   : > { %v301_v52 = vrot.slane %v300_v49, 2  ;;  %v289_v53 = vrot.slane %v288_v50, 2  ;;  %v322_v54 = vsel %vm285_vm3, %v321_v51, 0.0 }
 0x291   : > { %v323_v55 = vrot.slane %v322_v54, 4 }
 0x292   : > { %v302_v56 = vadd.f32 %v301_v52, %v300_v49  ;;  %v290_v57 = vadd.f32 %v289_v53, %v288_v50  ;;  %v307_v58 = vpop.permute.xlu1 %306 }
 0x293   : > { %v324_v59 = vadd.f32 %v323_v55, %v322_v54  ;;  %v309_v60 = vmul.f32 %v307_v58, %v861_v9 }
 0x294   : > { %v291_v61 = vrot.slane %v290_v57, 1  ;;  %v303_v1 = vrot.slane %v302_v56, 1 }
 0x295   : > { %v325_v62 = vrot.slane %v324_v59, 2  ;;  %v310_v63 = vsel %vm285_vm3, %v309_v60, 0.0 }
 0x296   : > { %v292_v0 = vadd.f32 %v291_v61, %v290_v57  ;;  %v304_v3 = vadd.f32 %v303_v1, %v302_v56  ;;  %v311_v6 = vrot.slane %v310_v63, 4 }
 0x297   : > { %v326_v2 = vadd.f32 %v325_v62, %v324_v59 }
 0x298   : > { %330 = vrot.lane.b32.xlu1 %v292_v0, %s693_s15  ;;  %v312_v7 = vadd.f32 %v311_v6, %v310_v63 }
 0x299   : > { %v327_v4 = vrot.slane %v326_v2, 1 }
 0x29a   : > { %v313_v8 = vrot.slane %v312_v7, 2 }
 0x29b   : > { %v328_v5 = vadd.f32 %v327_v4, %v326_v2 }
 0x29c   : > { %334 = vrot.lane.b32.xlu1 %v304_v3, %s694_s17  ;;  %v314_v9 = vadd.f32 %v313_v8, %v312_v7 }
 0x29e   : > { %v315_v11 = vrot.slane %v314_v9, 1 }
 0x2a0   : > { %338 = vrot.lane.b32.xlu1 %v328_v5, %s695_s27  ;;  %v316_v14 = vadd.f32 %v315_v11, %v314_v9 }
 0x30a   : > { %v331_v10 = vpop.permute.xlu1 %330 }
 0x30e   : > { %v335_v12 = vpop.permute.xlu1 %334 }
 0x30f   : > { %v342_v13 = vsel %vm341_vm4, %v331_v10, %v335_v12 }
 0x310   : > { %v343_v15 = vsel %vm178_vm1, %v342_v13, %v316_v14 }
 0x312   : > { %v339_v16 = vpop.permute.xlu1 %338 }
 0x313   : > { %v345_v17 = vsel %vm344_vm5, %v343_v15, %v339_v16 }
 0x314   : > { %347 = vst.msk [vmem:[%s172_s23] sm:$0x1] %vm346_vm6, %v345_v17 }
 0x315   : > { %623 = shalt.err (!%p620_p7)
}
 0x316   : > { %s624_s24 = scalar_lea.hbm %s881_s4, 16  ;;  %s628_s26 = scalar_lea.hbm %s927_s2, 32 }
 0x317   : > { %p625_p9 = scmp.ne.s32.totalorder %s881_s4, %s624_s24  ;;  %p629_p0 = scmp.lt.u32.totalorder %s881_s4, %s927_s2 }
 0x318   : > { %p630_p1 = scmp.lt.u32.totalorder %s628_s26, %s624_s24  ;;  %p632_p4 = scmp.lt.u32.totalorder %s624_s24, %s881_s4 }
 0x319   : > { %p626_p2 = pnand %p625_p9, %p803_p12 }
 0x31a   : > { %p631_p11 = por %p630_p1, %p629_p0 }
 0x31b   : > { %p627_p5 = pneg %p626_p2 }
 0x31c   : > { %p633_p6 = por %p632_p4, %p631_p11 }
 0x31e   : > { %p634_p8 = pnand %p633_p6, %p627_p5 }
 0x320   : > { %637 = shalt.err (!%p634_p8)
}
 0x321   : > { %478 = dma.vmem_to_hbm [thread:$0]  (%p803_p12), %s883_s28, 16, %s881_s4, %s349_s13  }
 0x322 PF: > { %s373_s15 = sand.u32 1, %s668_s9   ;;  %p942_p10 = scmp.ne.s32.totalorder %s932_s16, 0 }
 0x323   : > { %p943_p13 = scmp.ge.s32.totalorder %s680_s12, 2  ;;  %s374_s17 = scalar_lea.sflag [#allocation4], %s373_s15 }
 0x325   : > { %p489_p3 = pnand %p943_p13, %p942_p10 }
 0x327   : > { %663 = dma.done.wait (!%p489_p3), %s374_s17, 16  }
 0x328   : > { %665 = vsyncadd (!%p489_p3), %s374_s17, 4294967280  ;;  %p16_p7 = scmp.ge.s32.totalorder %s768_s21, 4   ;;  %s944_s9 = smov %s672_s10 }
 0x329   : > { %s945_s10 = smov %s676_s11  ;;  %s946_s11 = smov %s799_s8 }
 0x32a   : > { %s947_s12 = smov %s768_s21  ;;  %18 = sbr.rel (!%p16_p7) target bundleno = 6 (0x6), region = 77 }
 0x331   :  { %378 = vsyncpa [#allocation3], 1 }
 0x332   :  { %380 = vsyncpa [#allocation3 + $0x1], 1 }
 0x333   :  { %381 = vsyncpa [#allocation6], 1 }
 0x334   :  { %382 = vsyncpa [#allocation4], 1 }
 0x335   :  { %384 = vsyncpa [#allocation4 + $0x1], 1 }

</bundles_post_ra>
